<compile_context>
chip_gen: v7x
topology: tpu7x:2x2x1
jax: 0.10.0
libtpu: 0.0.40
codegen_flags: <defaults>
</compile_context>

<pallas_src>
import jax
import jax.numpy as jnp
import numpy as np
from jax.experimental import pallas as pl
from jax.experimental.pallas import tpu as pltpu


def _round_up(n, m):
    return ((n + m - 1) // m) * m


def _categorical_embedding_kernel(gidx_ref, table_ref, out_ref):
    """One row tile of the fused multi-variable embedding lookup.

    gidx_ref : (ROWS, V) int32    -- category ids already offset by v * S_pad
    table_ref: (V*S_pad, V*L) f32 -- block-diagonal stack of the V tables
    out_ref  : (ROWS, V*L)        -- concat over variables of the embeddings
    """
    gidx = gidx_ref[...]                                   # (R, V)
    vs = table_ref.shape[0]
    cols = jax.lax.broadcasted_iota(jnp.int32, (1, vs), 1)

    # Multi-hot: V ones per row, one per variable, in disjoint column ranges.
    multihot = (gidx[:, 0:1] == cols).astype(jnp.float32)
    for v in range(1, gidx.shape[1]):                      # static unroll, V small
        multihot = multihot + (gidx[:, v:v + 1] == cols).astype(jnp.float32)

    # Single lane-dense MXU matmul == concat_v(table_v[idx_v]) for every row.
    out_ref[...] = jnp.dot(
        multihot, table_ref[...], preferred_element_type=jnp.float32
    ).astype(out_ref.dtype)


def _categorical_embedding_pallas(gidx, blockdiag, rows_tile):
    n_pad, n_var = gidx.shape
    vs, vl = blockdiag.shape
    grid = (n_pad // rows_tile,)
    return pl.pallas_call(
        _categorical_embedding_kernel,
        out_shape=jax.ShapeDtypeStruct((n_pad, vl), blockdiag.dtype),
        grid_spec=pltpu.PrefetchScalarGridSpec(
            num_scalar_prefetch=0,
            grid=grid,
            in_specs=[
                pl.BlockSpec((rows_tile, n_var), lambda i: (i, 0)),
                pl.BlockSpec((vs, vl), lambda i: (0, 0)),   # constant weights
            ],
            out_specs=pl.BlockSpec((rows_tile, vl), lambda i: (i, 0)),
        ),
        compiler_params=pltpu.CompilerParams(
            dimension_semantics=("parallel",)),
    )(gidx, blockdiag)


def build_blockdiag_table(tables, s_pad):
    """Pack per-variable tables (S_v, L) into one (V*S_pad, V*L) block diagonal."""
    n_var = len(tables)
    d_model = tables[0].shape[1]
    bd = jnp.zeros((n_var * s_pad, n_var * d_model), jnp.float32)
    for v, t in enumerate(tables):
        s_v = t.shape[0]
        bd = bd.at[v * s_pad: v * s_pad + s_v,
                   v * d_model: (v + 1) * d_model].set(t.astype(jnp.float32))
    return bd


def categorical_embedding_forward(x, tables, rows_tile=512):
    """x: [B, C, T, V] int ids -> [B, C, T, V, L], matching CategoricalEmbedding."""
    if len(tables) == 0:
        # Module returns an empty tensor when there are no categorical features.
        return jnp.zeros((0,), jnp.float32)

    B, C, T, V = x.shape
    assert V == len(tables)
    L = tables[0].shape[1]

    s_pad = _round_up(max(int(t.shape[0]) for t in tables), 8)
    blockdiag = build_blockdiag_table(tables, s_pad)           # (V*s_pad, V*L)

    n_rows = B * C * T
    tile = min(rows_tile, _round_up(n_rows, 8))
    n_pad = _round_up(n_rows, tile)

    idx = x.reshape(n_rows, V).astype(jnp.int32)
    if n_pad != n_rows:
        # Padded rows use id 0 == padding row == zero embedding; sliced off below.
        idx = jnp.pad(idx, ((0, n_pad - n_rows), (0, 0)))
    gidx = idx + (jnp.arange(V, dtype=jnp.int32) * s_pad)[None, :]

    out = _categorical_embedding_pallas(gidx, blockdiag, tile)  # (n_pad, V*L)
    return out[:n_rows].reshape(B, C, T, V, L)


def init_embedding_tables(key, categorical_feature_size_list, d_model):
    keys = jax.random.split(key, len(categorical_feature_size_list))
    tables = []
    for k, size in zip(keys, categorical_feature_size_list):
        t = jax.random.normal(k, (size, d_model), jnp.float32)
        t = t.at[0].set(0.0)        # nn.Embedding(padding_idx=0): row 0 is zero
        tables.append(t)
    return tables


def categorical_embedding_reference(x, tables):
    """Pure-JAX reference: stack per-variable lookups -> [B, C, T, V, L]."""
    outs = [jnp.take(tables[v], x[..., v], axis=0) for v in range(x.shape[-1])]
    return jnp.stack(outs, axis=-2)


if __name__ == "__main__":
    B, C, T = 2, 4, 16
    d_model = 32
    categorical_feature_size_list = [7, 11, 5, 13]
    V = len(categorical_feature_size_list)

    key = jax.random.PRNGKey(0)
    k_tab, k_idx = jax.random.split(key)
    tables = init_embedding_tables(k_tab, categorical_feature_size_list, d_model)

    idx_keys = jax.random.split(k_idx, V)
    cols = [jax.random.randint(idx_keys[v], (B, C, T), 0,
                               categorical_feature_size_list[v], dtype=jnp.int32)
            for v in range(V)]
    x = jnp.stack(cols, axis=-1)                 # [B, C, T, V], includes some 0 ids

    out = categorical_embedding_forward(x, tables)
    jax.block_until_ready(out)

    assert out.shape == (B, C, T, V, d_model)
    ref = categorical_embedding_reference(x, tables)
    np.testing.assert_allclose(np.asarray(out), np.asarray(ref),
                               rtol=2e-2, atol=2e-2)

    # padding_idx=0 semantics: id 0 must produce an all-zero embedding row.
    pad_mask = (x == 0)[..., None]
    assert float(jnp.max(jnp.abs(jnp.where(pad_mask, out, 0.0)))) == 0.0

    print("KERNEL_OK")
</pallas_src>

<mosaic_0001>
module attributes {stable_mosaic.version = 11 : i64} {
  func.func @_categorical_embedding_kernel(%arg0: i32, %arg1: memref<128x4xi32, #tpu.memory_space<vmem>>, %arg2: memref<64x128xf32, #tpu.memory_space<vmem>>, %arg3: memref<128x128xf32, #tpu.memory_space<vmem>>) attributes {dimension_semantics = [#tpu.dimension_semantics<parallel>], iteration_bounds = array<i64: 1>, scalar_prefetch = 0 : i64, scratch_operands = 0 : i64, tpu.core_type = #tpu.core_type<tc>, window_params = [{transform_indices = @transform_0, window_bounds = array<i64: 128, 4>}, {pipeline_mode = #tpu.pipeline_mode<synchronous>, transform_indices = @transform_1, window_bounds = array<i64: 64, 128>}, {transform_indices = @transform_2, window_bounds = array<i64: 128, 128>}]} {
    %c0 = arith.constant 0 : index
    %c0_0 = arith.constant 0 : index
    %0 = vector.load %arg1[%c0, %c0_0] : memref<128x4xi32, #tpu.memory_space<vmem>>, vector<128x4xi32>
    %1 = tpu.iota {dimensions = array<i32: 1>} : vector<1x64xi32>
    %2 = vector.extract_strided_slice %0 {offsets = [0, 0], sizes = [128, 1], strides = [1, 1]} : vector<128x4xi32> to vector<128x1xi32>
    %3 = vector.broadcast %2 : vector<128x1xi32> to vector<128x64xi32>
    %4 = vector.broadcast %1 : vector<1x64xi32> to vector<128x64xi32>
    %5 = arith.cmpi eq, %3, %4 : vector<128x64xi32>
    %6 = arith.extui %5 : vector<128x64xi1> to vector<128x64xi32>
    %7 = arith.sitofp %6 : vector<128x64xi32> to vector<128x64xf32>
    %8 = vector.extract_strided_slice %0 {offsets = [0, 1], sizes = [128, 1], strides = [1, 1]} : vector<128x4xi32> to vector<128x1xi32>
    %9 = vector.broadcast %8 : vector<128x1xi32> to vector<128x64xi32>
    %10 = vector.broadcast %1 : vector<1x64xi32> to vector<128x64xi32>
    %11 = arith.cmpi eq, %9, %10 : vector<128x64xi32>
    %12 = arith.extui %11 : vector<128x64xi1> to vector<128x64xi32>
    %13 = arith.sitofp %12 : vector<128x64xi32> to vector<128x64xf32>
    %14 = arith.addf %7, %13 : vector<128x64xf32>
    %15 = vector.extract_strided_slice %0 {offsets = [0, 2], sizes = [128, 1], strides = [1, 1]} : vector<128x4xi32> to vector<128x1xi32>
    %16 = vector.broadcast %15 : vector<128x1xi32> to vector<128x64xi32>
    %17 = vector.broadcast %1 : vector<1x64xi32> to vector<128x64xi32>
    %18 = arith.cmpi eq, %16, %17 : vector<128x64xi32>
    %19 = arith.extui %18 : vector<128x64xi1> to vector<128x64xi32>
    %20 = arith.sitofp %19 : vector<128x64xi32> to vector<128x64xf32>
    %21 = arith.addf %14, %20 : vector<128x64xf32>
    %22 = vector.extract_strided_slice %0 {offsets = [0, 3], sizes = [128, 1], strides = [1, 1]} : vector<128x4xi32> to vector<128x1xi32>
    %23 = vector.broadcast %22 : vector<128x1xi32> to vector<128x64xi32>
    %24 = vector.broadcast %1 : vector<1x64xi32> to vector<128x64xi32>
    %25 = arith.cmpi eq, %23, %24 : vector<128x64xi32>
    %26 = arith.extui %25 : vector<128x64xi1> to vector<128x64xi32>
    %27 = arith.sitofp %26 : vector<128x64xi32> to vector<128x64xf32>
    %28 = arith.addf %21, %27 : vector<128x64xf32>
    %c0_1 = arith.constant 0 : index
    %c0_2 = arith.constant 0 : index
    %29 = vector.load %arg2[%c0_1, %c0_2] : memref<64x128xf32, #tpu.memory_space<vmem>>, vector<64x128xf32>
    %cst = arith.constant dense<0.000000e+00> : vector<128x128xf32>
    %30 = tpu.matmul %28, %29, %cst {dimension_numbers = #tpu.dot_dimension_numbers<[1], [0], [0], [1], [0, 0, 1, 1], [], []>} : vector<128x64xf32>, vector<64x128xf32>, vector<128x128xf32> -> vector<128x128xf32>
    %c0_3 = arith.constant 0 : index
    %c0_4 = arith.constant 0 : index
    %31 = vector.load %arg3[%c0_3, %c0_4] : memref<128x128xf32, #tpu.memory_space<vmem>>, vector<128x128xf32>
    tpu.vector_store %arg3[%c0_3, %c0_4], %30 {strides = array<i32>} : memref<128x128xf32, #tpu.memory_space<vmem>>, vector<128x128xf32>,
    return
  }
  func.func @transform_0(%arg0: i32) -> (i32, i32) {
    %c0_i32 = arith.constant 0 : i32
    %c0_i32_0 = arith.constant 0 : i32
    return %arg0, %c0_i32 : i32, i32
  }
  func.func @transform_1(%arg0: i32) -> (i32, i32) {
    %c0_i32 = arith.constant 0 : i32
    %c0_i32_0 = arith.constant 0 : i32
    %c0_i32_1 = arith.constant 0 : i32
    return %c0_i32, %c0_i32_0 : i32, i32
  }
  func.func @transform_2(%arg0: i32) -> (i32, i32) {
    %c0_i32 = arith.constant 0 : i32
    %c0_i32_0 = arith.constant 0 : i32
    return %arg0, %c0_i32 : i32, i32
  }
}

</mosaic_0001>

<bundles_post_ra>
// kernel: tpu_custom_call.1
= control target key start
LH: loop header
LB: loop body
LE: loop exit
PB: predicated region body
PF: predicated region fallthrough
CT: control target
= control target key end

     0   :  { %v927_v2 = vmov 3   ;;  %v928_v3 = vmov 1   ;;  %s1349_s0 = inlined_call_operand.vmem [shape: s32[128,4], index: 0, kind: input, shape index: {}]   ;;  %s1350_s1 = inlined_call_operand.vmem [shape: f32[64,128], index: 1, kind: input, shape index: {}]   ;;  %s1351_s2 = inlined_call_operand.hbm [shape: f32[128,128], index: 2, kind: output, shape index: {}]  }
   0x1   :  { %v953_v0 = vld [vmem:[%s1349_s0 + $0x10] sm:$0xff]  ;;  %v12_v1 = vld [vmem:[%s1349_s0] sm:$0xff]  ;;  %885 = vset.pattern.permute.xlu0 %v927_v2  ;;  %872 = vset.pattern.permute.xlu1 %v928_v3  ;;  %v964_v4 = vld [vmem:[%s1349_s0 + $0x18] sm:$0xff] }
   0x2   :  { %357 = vperm.xlu0 %885, %v953_v0   ;;  %127 = vperm.xlu1 %872, %v12_v1   ;;  %v969_v5 = vld [vmem:[%s1349_s0 + $0x40] sm:$0xff] }
   0x3   :  { %7 = vsyncpa [#allocation3], 0  ;;  %v976_v6 = vld [vmem:[%s1349_s0 + $0x48] sm:$0xff]  ;;  %v929_v7 = vmov 0   ;;  %v930_v9 = vmov 2   ;;  %v993_v10 = vld [vmem:[%s1349_s0 + $0x60] sm:$0xff]  ;;  %v28_v46 = vlaneseq }
   0x4   :  { %v13_v8 = vld [vmem:[%s1349_s0 + $0x8] sm:$0xff]  ;;  %v1000_v11 = vld [vmem:[%s1349_s0 + $0x50] sm:$0xff]  ;;  %v1021_v14 = vld [vmem:[%s1349_s0 + $0x38] sm:$0xff]  ;;  %v931_v53 = vmov 0.0   ;;  %vm470_vm4 = vcmask 523264  }
   0x5   :  { %v1005_v12 = vld [vmem:[%s1349_s0 + $0x68] sm:$0xff]  ;;  %v1013_v13 = vld [vmem:[%s1349_s0 + $0x30] sm:$0xff]  ;;  %v462_v15 = vld [vmem:[%s1350_s1] sm:$0xff]  ;;  %v1139_v49 = vand.u32 127, %v28_v46 }
   0x6   :  { %360 = vperm.xlu0 %885, %v964_v4   ;;  %151 = vperm.xlu1 %872, %v969_v5   ;;  %v463_v16 = vld [vmem:[%s1350_s1 + $0x8] sm:$0xff]  ;;  %v1036_v18 = vld [vmem:[%s1349_s0 + $0x58] sm:$0xff]  ;;  %v464_v19 = vld [vmem:[%s1350_s1 + $0x10] sm:$0xff] }
   0x7   :  { %v840_v17 = vpack.c.bf16 %v463_v16, %v462_v15  ;;  %v465_v20 = vld [vmem:[%s1350_s1 + $0x18] sm:$0xff]  ;;  %v466_v22 = vld [vmem:[%s1350_s1 + $0x20] sm:$0xff]  ;;  %v467_v23 = vld [vmem:[%s1350_s1 + $0x28] sm:$0xff] }
   0x8   :  { %v844_v21 = vpack.c.bf16 %v465_v20, %v464_v19  ;;  %v1058_v24 = vld [vmem:[%s1349_s0 + $0x70] sm:$0xff]  ;;  %v848_v25 = vpack.c.bf16 %v467_v23, %v466_v22  ;;  %v469_v27 = vld [vmem:[%s1350_s1 + $0x38] sm:$0xff]  ;;  %v16_v30 = vld [vmem:[%s1349_s0 + $0x20] sm:$0xff] }
   0x9   :  { %841 = vmatprep.subr.bf16.mxu0 %v840_v17  ;;  %856 = vmatprep.subr.bf16.mxu1 %v840_v17  ;;  %v468_v26 = vld [vmem:[%s1350_s1 + $0x30] sm:$0xff]  ;;  %v1071_v28 = vld [vmem:[%s1349_s0 + $0x78] sm:$0xff]  ;;  %v17_v31 = vld [vmem:[%s1349_s0 + $0x28] sm:$0xff]  ;;  %s932_s0 = smov [#allocation2]  }
   0xa   :  { %889 = vset.pattern.permute.xlu0 %v929_v7  ;;  %873 = vset.pattern.permute.xlu1 %v929_v7  ;;  %v852_v29 = vpack.c.bf16 %v469_v27, %v468_v26  ;;  %s685_s28 = sshll.u32 %s932_s0, 4  ;;  %s686_s28 = int_to_ptr.vmem [resolvable:$true] %s685_s28 }
   0xb   :  { %31 = vperm.xlu0 %889, %v12_v1   ;;  %58 = vperm.xlu1 %873, %v976_v6   ;;  %s903_s29 = scalar_lea.vmem %s686_s28, 2048  ;;  %p908_p1 = scmp.lt.s32.totalorder %s686_s28, %s686_s28 }
   0xc   :  { %843 = vmatpush3.bf16.msra.mxu0 %v840_v17  ;;  %860 = vmatpush3.bf16.msra.mxu1 %v840_v17  ;;  %p904_p0 = scmp.ne.s32.totalorder %s686_s28, %s903_s29  ;;  %p909_p2 = scmp.lt.s32.totalorder %s903_s29, %s903_s29 }
   0xd   :  { %845 = vmatprep.subr.bf16.mxu0 %v844_v21  ;;  %857 = vmatprep.subr.bf16.mxu1 %v844_v21 }
   0xe   :  { %p910_p3 = por %p909_p2, %p908_p1 }
   0xf   :  { %55 = vperm.xlu0 %889, %v969_v5   ;;  %874 = vset.pattern.permute.xlu1 %v928_v3 }
  0x10   :  { %154 = vperm.xlu1 %874, %v976_v6   ;;  %847 = vmatpush3.bf16.msra.mxu0 %v844_v21  ;;  %p911_p4 = pnand %p910_p3, %p904_p0 }
  0x11   :  { %861 = vmatpush3.bf16.msra.mxu1 %v844_v21  ;;  %849 = vmatprep.subr.bf16.mxu0 %v848_v25 }
  0x12   :  { %858 = vmatprep.subr.bf16.mxu1 %v848_v25 }
  0x13   :  { %34 = vperm.xlu0 %889, %v13_v8  }
  0x14   :  { %875 = vset.pattern.permute.xlu1 %v930_v9  ;;  %851 = vmatpush3.bf16.msra.mxu0 %v848_v25 }
  0x15   :  { %239 = vperm.xlu1 %875, %v12_v1   ;;  %862 = vmatpush3.bf16.msra.mxu1 %v848_v25 }
  0x16   :  { %853 = vmatprep.subr.bf16.mxu0 %v852_v29  ;;  %859 = vmatprep.subr.bf16.mxu1 %v852_v29 }
  0x17   :  { %37 = vperm.xlu0 %889, %v953_v0  }
  0x18   :  { %855 = vmatpush3.bf16.msra.mxu0 %v852_v29 }
  0x19   :  { %242 = vperm.xlu1 %875, %v13_v8   ;;  %863 = vmatpush3.bf16.msra.mxu1 %v852_v29 }
  0x1b   :  { %40 = vperm.xlu0 %889, %v964_v4  }
  0x1d   :  { %266 = vperm.xlu1 %875, %v976_v6  }
  0x1f   :  { %67 = vperm.xlu0 %889, %v993_v10  }
  0x21   :  { %876 = vset.pattern.permute.xlu1 %v929_v7 }
  0x22   :  { %61 = vperm.xlu1 %876, %v1000_v11  }
  0x23   :  { %70 = vperm.xlu0 %889, %v1005_v12  }
  0x26   :  { %877 = vset.pattern.permute.xlu1 %v928_v3 }
  0x27   :  { %49 = vperm.xlu0 %889, %v1013_v13   ;;  %133 = vperm.xlu1 %877, %v953_v0  }
  0x2b   :  { %52 = vperm.xlu0 %889, %v1021_v14   ;;  %878 = vset.pattern.permute.xlu1 %v927_v2 }
  0x2c   :  { %351 = vperm.xlu1 %878, %v12_v1  }
  0x2f   :  { %895 = vset.pattern.permute.xlu0 %v928_v3 }
  0x30   :  { %130 = vperm.xlu0 %895, %v13_v8   ;;  %375 = vperm.xlu1 %878, %v969_v5  }
  0x34   :  { %157 = vperm.xlu0 %895, %v1000_v11   ;;  %879 = vset.pattern.permute.xlu1 %v929_v7 }
  0x35   :  { %64 = vperm.xlu1 %879, %v1036_v18  }
  0x38   :  { %160 = vperm.xlu0 %895, %v1036_v18  }
  0x39   :  { %880 = vset.pattern.permute.xlu1 %v928_v3 }
  0x3a   :  { %136 = vperm.xlu1 %880, %v964_v4  }
  0x3c   :  { %169 = vperm.xlu0 %895, %v1058_v24  }
  0x3e   :  { %881 = vset.pattern.permute.xlu1 %v927_v2 }
  0x3f   :  { %354 = vperm.xlu1 %881, %v13_v8  }
  0x40   :  { %172 = vperm.xlu0 %895, %v1071_v28  }
  0x43   :  { %378 = vperm.xlu1 %881, %v976_v6  }
  0x44   :  { %898 = vset.pattern.permute.xlu0 %v930_v9 }
  0x45   :  { %263 = vperm.xlu0 %898, %v969_v5  }
  0x47   :  { %882 = vset.pattern.permute.xlu1 %v930_v9 }
  0x48   :  { %269 = vperm.xlu1 %882, %v1000_v11  }
  0x49   :  { %245 = vperm.xlu0 %898, %v953_v0  }
  0x4c   :  { %248 = vperm.xlu1 %882, %v964_v4  }
  0x4d   :  { %272 = vperm.xlu0 %898, %v1036_v18  }
  0x50   :  { %883 = vset.pattern.permute.xlu1 %v929_v7 }
  0x51   :  { %43 = vperm.xlu1 %883, %v16_v30   ;;  %275 = vperm.xlu0 %898, %v993_v10  }
  0x55   :  { %884 = vset.pattern.permute.xlu1 %v928_v3  ;;  %257 = vperm.xlu0 %898, %v1013_v13  }
  0x56   :  { %139 = vperm.xlu1 %884, %v16_v30  }
  0x59   :  { %284 = vperm.xlu0 %898, %v1071_v28  }
  0x5a   :  { %163 = vperm.xlu1 %884, %v993_v10  }
  0x5d   :  { %902 = vset.pattern.permute.xlu0 %v927_v2 }
  0x5e   :  { %886 = vset.pattern.permute.xlu1 %v927_v2  ;;  %393 = vperm.xlu0 %902, %v1058_v24  }
  0x5f   :  { %381 = vperm.xlu1 %886, %v1000_v11  }
  0x63   :  { %887 = vset.pattern.permute.xlu1 %v929_v7 }
  0x64   :  { %46 = vperm.xlu1 %887, %v17_v31  }
  0x68   :  { %888 = vset.pattern.permute.xlu1 %v928_v3 }
  0x69   :  { %142 = vperm.xlu1 %888, %v17_v31  }
  0x6d   :  { %166 = vperm.xlu1 %888, %v1005_v12  }
  0x71   :  { %890 = vset.pattern.permute.xlu1 %v927_v2 }
  0x72   :  { %384 = vperm.xlu1 %890, %v1036_v18  }
  0x76   :  { %891 = vset.pattern.permute.xlu1 %v930_v9 }
  0x77   :  { %251 = vperm.xlu1 %891, %v16_v30  }
  0x7b   :  { %254 = vperm.xlu1 %891, %v17_v31  }
  0x7f   :  { %278 = vperm.xlu1 %891, %v1005_v12  }
  0x81   :  { %v128_v32 = vpop.permute.xlu1 %127  ;;  %v1106_v33 = vpop.permute.xlu0 %357 }
  0x82   :  { %vm174_vm1 = vcmp.eq.s32.totalorder %v128_v32, %v1139_v49 }
  0x83   :  { %892 = vset.pattern.permute.xlu1 %v929_v7  ;;  %v712_v55 = vsel %vm174_vm1, 1.0, %v931_v53 }
  0x84   :  { %73 = vperm.xlu1 %892, %v1058_v24  }
  0x85   :  { %v1110_v34 = vpop.permute.xlu1 %151  ;;  %v1112_v35 = vpop.permute.xlu0 %360 }
  0x86   :  { %vm182_vm11 = vcmp.eq.s32.totalorder %v1110_v34, %v1139_v49 }
  0x87   :  { %v720_v18 = vsel %vm182_vm11, 1.0, %v931_v53 }
  0x88   :  { %893 = vset.pattern.permute.xlu1 %v928_v3 }
  0x89   :  { %145 = vperm.xlu1 %893, %v1013_v13  }
  0x8a   :  { %v32_v36 = vpop.permute.xlu0 %31  ;;  %v1116_v37 = vpop.permute.xlu1 %58 }
  0x8b   :  { %vm78_vm0 = vcmp.eq.s32.totalorder %v32_v36, %v1139_v49  ;;  %vm87_vm12 = vcmp.eq.s32.totalorder %v1116_v37, %v1139_v49 }
  0x8c   :  { %v696_v54 = vsel %vm78_vm0, 1.0, %v931_v53  ;;  %v705_v19 = vsel %vm87_vm12, 1.0, %v931_v53 }
  0x8d   :  { %894 = vset.pattern.permute.xlu1 %v927_v2  ;;  %v222_v57 = vadd.f32 %v712_v55, %v696_v54 }
  0x8e   :  { %v1119_v38 = vpop.permute.xlu0 %55  ;;  %363 = vperm.xlu1 %894, %v16_v30  }
  0x8f   :  { %v1121_v39 = vpop.permute.xlu1 %154  ;;  %vm86_vm8 = vcmp.eq.s32.totalorder %v1119_v38, %v1139_v49 }
  0x90   :  { %vm183_vm9 = vcmp.eq.s32.totalorder %v1121_v39, %v1139_v49 }
  0x91   :  { %v721_v15 = vsel %vm183_vm9, 1.0, %v931_v53 }
  0x92   :  { %387 = vperm.xlu1 %894, %v993_v10   ;;  %v35_v40 = vpop.permute.xlu0 %34  ;;  %v231_v21 = vadd.f32 %v721_v15, %v705_v19 }
  0x93   :  { %vm79_vm5 = vcmp.eq.s32.totalorder %v35_v40, %v1139_v49 }
  0x94   :  { %v240_v41 = vpop.permute.xlu1 %239  ;;  %v697_v5 = vsel %vm79_vm5, 1.0, %v931_v53 }
  0x95   :  { %vm286_vm2 = vcmp.eq.s32.totalorder %v240_v41, %v1139_v49 }
  0x96   :  { %896 = vset.pattern.permute.xlu1 %v929_v7  ;;  %v1125_v42 = vpop.permute.xlu0 %37  ;;  %v728_v56 = vsel %vm286_vm2, 1.0, %v931_v53 }
  0x97   :  { %76 = vperm.xlu1 %896, %v1071_v28   ;;  %v334_v60 = vadd.f32 %v728_v56, %v222_v57  ;;  %vm80_vm14 = vcmp.eq.s32.totalorder %v1125_v42, %v1139_v49 }
  0x98   :  { %v243_v43 = vpop.permute.xlu1 %242 }
  0x99   :  { %vm287_vm7 = vcmp.eq.s32.totalorder %v243_v43, %v1139_v49 }
  0x9a   :  { %v1128_v44 = vpop.permute.xlu0 %40 }
  0x9b   :  { %897 = vset.pattern.permute.xlu1 %v928_v3  ;;  %vm81_vm1 = vcmp.eq.s32.totalorder %v1128_v44, %v1139_v49 }
  0x9c   :  { %148 = vperm.xlu1 %897, %v1021_v14   ;;  %v1132_v45 = vpop.permute.xlu1 %266  ;;  %v699_v30 = vsel %vm81_vm1, 1.0, %v931_v53 }
  0x9d   :  { %vm295_vm13 = vcmp.eq.s32.totalorder %v1132_v45, %v1139_v49 }
  0x9e   :  { %v1134_v47 = vpop.permute.xlu0 %67  ;;  %v737_v23 = vsel %vm295_vm13, 1.0, %v931_v53 }
  0xa0   :  { %899 = vset.pattern.permute.xlu1 %v927_v2 }
  0xa1   :  { %366 = vperm.xlu1 %899, %v17_v31   ;;  %v1137_v48 = vpop.permute.xlu1 %61  ;;  %v343_v31 = vadd.f32 %v737_v23, %v231_v21 }
  0xa2   :  { %v1141_v50 = vpop.permute.xlu0 %70  ;;  %vm88_vm11 = vcmp.eq.s32.totalorder %v1137_v48, %v1139_v49 }
  0xa5   :  { %390 = vperm.xlu1 %899, %v1005_v12  }
  0xa6   :  { %v1147_v51 = vpop.permute.xlu1 %133  ;;  %v1149_v52 = vpop.permute.xlu0 %49 }
  0xa7   :  { %vm176_vm15 = vcmp.eq.s32.totalorder %v1147_v51, %v1139_v49 }
  0xa8   :  { %v714_v25 = vsel %vm176_vm15, 1.0, %v931_v53 }
  0xa9   :  { %900 = vset.pattern.permute.xlu1 %v930_v9  ;;  %v729_v9 = vsel %vm287_vm7, 1.0, %v931_v53 }
  0xaa   :  { %281 = vperm.xlu1 %900, %v1058_v24   ;;  %v1156_v58 = vpop.permute.xlu0 %52  ;;  %v698_v24 = vsel %vm80_vm14, 1.0, %v931_v53 }
  0xab   :  { %v352_v59 = vpop.permute.xlu1 %351  ;;  %v224_v36 = vadd.f32 %v714_v25, %v698_v24 }
  0xac   :  { %vm398_vm3 = vcmp.eq.s32.totalorder %v352_v59, %v1139_v49  ;;  %v706_v59 = vsel %vm88_vm11, 1.0, %v931_v53 }
  0xad   :  { %v744_v61 = vsel %vm398_vm3, 1.0, %v931_v53 }
  0xae   :  { %260 = vperm.xlu1 %900, %v1021_v14   ;;  %v446_v62 = vadd.f32 %v744_v61, %v334_v60 }
  0xaf   :  { %v131_v63 = vpop.permute.xlu0 %130  ;;  %v376_v0 = vpop.permute.xlu1 %375 }
  0xb0   :  { %816 = vmatprep.mubr.msk.f32.mxu0 %vm470_vm4, %v446_v62  ;;  %vm175_vm6 = vcmp.eq.s32.totalorder %v131_v63, %v1139_v49  ;;  %vm406_vm2 = vcmp.eq.s32.totalorder %v376_v0, %v1139_v49 }
  0xb1   :  { %v713_v6 = vsel %vm175_vm6, 1.0, %v931_v53  ;;  %vm400_vm6 = vcmp.eq.s32.totalorder %v1106_v33, %v1139_v49  ;;  %v752_v32 = vsel %vm406_vm2, 1.0, %v931_v53 }
  0xb2   :  { %901 = vset.pattern.permute.xlu1 %v927_v2  ;;  %v223_v2 = vadd.f32 %v713_v6, %v697_v5  ;;  %v746_v39 = vsel %vm400_vm6, 1.0, %v931_v53 }
  0xb3   :  { %v1163_v1 = vpop.permute.xlu0 %157  ;;  %369 = vperm.xlu1 %901, %v1013_v13  }
  0xb4   :  { %v1166_v3 = vpop.permute.xlu1 %64  ;;  %v335_v11 = vadd.f32 %v729_v9, %v223_v2 }
  0xb5   :  { %vm89_vm15 = vcmp.eq.s32.totalorder %v1166_v3, %v1139_v49 }
  0xb6   :  { %v707_v9 = vsel %vm89_vm15, 1.0, %v931_v53  ;;  %vm91_vm15 = vcmp.eq.s32.totalorder %v1141_v50, %v1139_v49 }
  0xb7   :  { %v1170_v4 = vpop.permute.xlu0 %160  ;;  %372 = vperm.xlu1 %901, %v1021_v14   ;;  %v704_v14 = vsel %vm86_vm8, 1.0, %v931_v53  ;;  %vm401_vm8 = vcmp.eq.s32.totalorder %v1112_v35, %v1139_v49 }
  0xb8   :  { %v230_v20 = vadd.f32 %v720_v18, %v704_v14  ;;  %v747_v44 = vsel %vm401_vm8, 1.0, %v931_v53  ;;  %vm185_vm14 = vcmp.eq.s32.totalorder %v1170_v4, %v1139_v49 }
  0xb9   :  { %v137_v7 = vpop.permute.xlu1 %136  ;;  %v723_v2 = vsel %vm185_vm14, 1.0, %v931_v53 }
  0xba   :  { %vm177_vm5 = vcmp.eq.s32.totalorder %v137_v7, %v1139_v49 }
  0xbb   :  { %396 = vperm.xlu1 %901, %v1071_v28   ;;  %v1177_v8 = vpop.permute.xlu0 %169  ;;  %v715_v37 = vsel %vm177_vm5, 1.0, %v931_v53 }
  0xbc   :  { %v225_v43 = vadd.f32 %v715_v37, %v699_v30 }
  0xbe   :  { %v355_v10 = vpop.permute.xlu1 %354 }
  0xbf   :  { %vm399_vm10 = vcmp.eq.s32.totalorder %v355_v10, %v1139_v49  ;;  %v1185_v12 = vpop.permute.xlu0 %172 }
  0xc0   :  { %v745_v13 = vsel %vm399_vm10, 1.0, %v931_v53  ;;  %vm184_vm10 = vcmp.eq.s32.totalorder %v1163_v1, %v1139_v49 }
  0xc1   :  { %v447_v16 = vadd.f32 %v745_v13, %v335_v11  ;;  %v722_v57 = vsel %vm184_vm10, 1.0, %v931_v53  ;;  %v233_v11 = vadd.f32 %v723_v2, %v707_v9 }
  0xc2   :  { %v379_v17 = vpop.permute.xlu1 %378  ;;  %v232_v61 = vadd.f32 %v722_v57, %v706_v59 }
  0xc3   :  { %817 = vmatmul.mubr.msk.f32.vlgmr.msra.gmra.mrb[0].mxu0 %vm470_vm4, %v447_v16  ;;  %vm407_vm0 = vcmp.eq.s32.totalorder %v379_v17, %v1139_v49 }
  0xc4   :  { %v264_v22 = vpop.permute.xlu0 %263  ;;  %v753_v27 = vsel %vm407_vm0, 1.0, %v931_v53 }
  0xc5   :  { %vm294_vm3 = vcmp.eq.s32.totalorder %v264_v22, %v1139_v49  ;;  %v455_v33 = vadd.f32 %v753_v27, %v343_v31 }
  0xc6   :  { %v736_v26 = vsel %vm294_vm3, 1.0, %v931_v53  ;;  %vm90_vm3 = vcmp.eq.s32.totalorder %v1134_v47, %v1139_v49 }
  0xc7   :  { %v342_v28 = vadd.f32 %v736_v26, %v230_v20  ;;  %v270_v29 = vpop.permute.xlu1 %269  ;;  %v708_v22 = vsel %vm90_vm3, 1.0, %v931_v53 }
  0xc8   :  { %v246_v34 = vpop.permute.xlu0 %245  ;;  %vm296_vm12 = vcmp.eq.s32.totalorder %v270_v29, %v1139_v49 }
  0xc9   :  { %vm288_vm7 = vcmp.eq.s32.totalorder %v246_v34, %v1139_v49  ;;  %v454_v38 = vadd.f32 %v752_v32, %v342_v28  ;;  %v738_v60 = vsel %vm296_vm12, 1.0, %v931_v53 }
  0xca   :  { %v730_v40 = vsel %vm288_vm7, 1.0, %v931_v53  ;;  %v344_v63 = vadd.f32 %v738_v60, %v232_v61 }
  0xcb   :  { %v336_v41 = vadd.f32 %v730_v40, %v224_v36  ;;  %828 = vmatprep.mubr.msk.f32.mxu1 %vm470_vm4, %v454_v38  ;;  %v249_v42 = vpop.permute.xlu1 %248 }
  0xcc   :  { %vm289_vm9 = vcmp.eq.s32.totalorder %v249_v42, %v1139_v49  ;;  %829 = vmatmul.mubr.msk.f32.vlgmr.msra.gmra.mrb[0].mxu1 %vm470_vm4, %v455_v33  ;;  %v273_v6 = vpop.permute.xlu0 %272 }
  0xcd   :  { %v448_v45 = vadd.f32 %v746_v39, %v336_v41  ;;  %v731_v46 = vsel %vm289_vm9, 1.0, %v931_v53  ;;  %vm297_vm0 = vcmp.eq.s32.totalorder %v273_v6, %v1139_v49 }
  0xce   :  { %v337_v51 = vadd.f32 %v731_v46, %v225_v43  ;;  %v739_v10 = vsel %vm297_vm0, 1.0, %v931_v53 }
  0xcf   :  { %819 = vmatprep.mubr.msk.f32.mxu0 %vm470_vm4, %v448_v45  ;;  %v345_v14 = vadd.f32 %v739_v10, %v233_v11 }
  0xd0   :  { %v449_v35 = vadd.f32 %v747_v44, %v337_v51  ;;  %v44_v54 = vpop.permute.xlu1 %43  ;;  %v276_v21 = vpop.permute.xlu0 %275 }
  0xd1   :  { %vm82_vm5 = vcmp.eq.s32.totalorder %v44_v54, %v1139_v49  ;;  %vm298_vm8 = vcmp.eq.s32.totalorder %v276_v21, %v1139_v49 }
  0xd2   :  { %820 = vmatmul.mubr.msk.f32.gmra.mrb[2].mxu0 %vm470_vm4, %v449_v35  ;;  %v700_v23 = vsel %vm82_vm5, 1.0, %v931_v53  ;;  %v740_v29 = vsel %vm298_vm8, 1.0, %v931_v53  ;;  %v709_v35 = vsel %vm91_vm15, 1.0, %v931_v53  ;;  %vm189_vm15 = vcmp.eq.s32.totalorder %v1185_v12, %v1139_v49 }
  0xd4   :  { %v258_v40 = vpop.permute.xlu0 %257 }
  0xd5   :  { %v140_v55 = vpop.permute.xlu1 %139 }
  0xd6   :  { %vm178_vm2 = vcmp.eq.s32.totalorder %v140_v55, %v1139_v49 }
  0xd7   :  { %v716_v20 = vsel %vm178_vm2, 1.0, %v931_v53  ;;  %vm188_vm2 = vcmp.eq.s32.totalorder %v1177_v8, %v1139_v49 }
  0xd8   :  { %v226_v47 = vadd.f32 %v716_v20, %v700_v23  ;;  %v285_v51 = vpop.permute.xlu0 %284 }
  0xd9   :  { %v164_v56 = vpop.permute.xlu1 %163 }
  0xda   :  { %vm186_vm6 = vcmp.eq.s32.totalorder %v164_v56, %v1139_v49 }
  0xdb   :  { %v724_v24 = vsel %vm186_vm6, 1.0, %v931_v53 }
  0xdc   :  { %v234_v27 = vadd.f32 %v724_v24, %v708_v22 }
  0xdd   :  { %v394_v60 = vpop.permute.xlu0 %393 }
  0xde   :  { %v382_v62 = vpop.permute.xlu1 %381  ;;  %v346_v34 = vadd.f32 %v740_v29, %v234_v27  ;;  %vm412_vm6 = vcmp.eq.s32.totalorder %v394_v60, %v1139_v49 }
  0xdf   :  { %vm408_vm13 = vcmp.eq.s32.totalorder %v382_v62, %v1139_v49  ;;  %v726_v62 = vsel %vm188_vm2, 1.0, %v931_v53 }
  0xe0   :  { %v754_v0 = vsel %vm408_vm13, 1.0, %v931_v53 }
  0xe1   :  { %v456_v1 = vadd.f32 %v754_v0, %v344_v63 }
  0xe3   :  { %831 = vmatprep.mubr.msk.f32.mxu1 %vm470_vm4, %v456_v1  ;;  %v47_v48 = vpop.permute.xlu1 %46 }
  0xe4   :  { %vm83_vm12 = vcmp.eq.s32.totalorder %v47_v48, %v1139_v49 }
  0xe5   :  { %v701_v41 = vsel %vm83_vm12, 1.0, %v931_v53  ;;  %vm85_vm12 = vcmp.eq.s32.totalorder %v1156_v58, %v1139_v49 }
  0xe8   :  { %v143_v5 = vpop.permute.xlu1 %142 }
  0xe9   :  { %vm179_vm11 = vcmp.eq.s32.totalorder %v143_v5, %v1139_v49  ;;  %v758_v5 = vsel %vm412_vm6, 1.0, %v931_v53 }
  0xea   :  { %v717_v33 = vsel %vm179_vm11, 1.0, %v931_v53 }
  0xeb   :  { %v227_v43 = vadd.f32 %v717_v33, %v701_v41 }
  0xec   :  { %v167_v7 = vpop.permute.xlu1 %166 }
  0xed   :  { %vm187_vm14 = vcmp.eq.s32.totalorder %v167_v7, %v1139_v49 }
  0xee   :  { %v725_v44 = vsel %vm187_vm14, 1.0, %v931_v53 }
  0xef   :  { %v235_v56 = vadd.f32 %v725_v44, %v709_v35 }
  0xf1   :  { %v385_v13 = vpop.permute.xlu1 %384 }
  0xf2   :  { %vm409_vm1 = vcmp.eq.s32.totalorder %v385_v13, %v1139_v49 }
  0xf3   :  { %v755_v15 = vsel %vm409_vm1, 1.0, %v931_v53 }
  0xf4   :  { %v457_v4 = vadd.f32 %v755_v15, %v345_v14 }
  0xf6   :  { %832 = vmatmul.mubr.msk.f32.gmra.mrb[2].mxu1 %vm470_vm4, %v457_v4  ;;  %v252_v3 = vpop.permute.xlu1 %251  ;;  %v703_v4 = vsel %vm85_vm12, 1.0, %v931_v53 }
  0xf7   :  { %vm290_vm7 = vcmp.eq.s32.totalorder %v252_v3, %v1139_v49 }
  0xf8   :  { %v732_v25 = vsel %vm290_vm7, 1.0, %v931_v53 }
  0xf9   :  { %v338_v28 = vadd.f32 %v732_v25, %v226_v47 }
  0xfa   :  { %v255_v16 = vpop.permute.xlu1 %254 }
  0xfb   :  { %vm291_vm13 = vcmp.eq.s32.totalorder %v255_v16, %v1139_v49 }
  0xfc   :  { %v733_v42 = vsel %vm291_vm13, 1.0, %v931_v53 }
  0xfd   :  { %v339_v46 = vadd.f32 %v733_v42, %v227_v43 }
  0xfe   :  { %v279_v17 = vpop.permute.xlu1 %278 }
  0xff   :  { %vm299_vm0 = vcmp.eq.s32.totalorder %v279_v17, %v1139_v49 }
 0x100   :  { %v741_v54 = vsel %vm299_vm0, 1.0, %v931_v53 }
 0x101   :  { %v347_v59 = vadd.f32 %v741_v54, %v235_v56 }
 0x103   :  { %v74_v18 = vpop.permute.xlu1 %73 }
 0x104   :  { %vm92_vm3 = vcmp.eq.s32.totalorder %v74_v18, %v1139_v49 }
 0x105   :  { %v710_v63 = vsel %vm92_vm3, 1.0, %v931_v53 }
 0x106   :  { %v236_v1 = vadd.f32 %v726_v62, %v710_v63 }
 0x108   :  { %v1259_v19 = vpop.permute.xlu1 %145 }
 0x109   :  { %vm180_vm7 = vcmp.eq.s32.totalorder %v1259_v19, %v1139_v49  ;;  %v727_v19 = vsel %vm189_vm15, 1.0, %v931_v53 }
 0x10a   :  { %v718_v6 = vsel %vm180_vm7, 1.0, %v931_v53 }
 0x10d   :  { %v364_v26 = vpop.permute.xlu1 %363 }
 0x10e   :  { %vm402_vm9 = vcmp.eq.s32.totalorder %v364_v26, %v1139_v49 }
 0x10f   :  { %v748_v30 = vsel %vm402_vm9, 1.0, %v931_v53  ;;  %vm84_vm9 = vcmp.eq.s32.totalorder %v1149_v52, %v1139_v49 }
 0x110   :  { %v450_v31 = vadd.f32 %v748_v30, %v338_v28  ;;  %v702_v9 = vsel %vm84_vm9, 1.0, %v931_v53 }
 0x111   :  { %v388_v32 = vpop.permute.xlu1 %387  ;;  %v228_v11 = vadd.f32 %v718_v6, %v702_v9 }
 0x112   :  { %vm410_vm10 = vcmp.eq.s32.totalorder %v388_v32, %v1139_v49  ;;  %822 = vmatprep.mubr.msk.f32.mxu0 %vm470_vm4, %v450_v31 }
 0x113   :  { %v756_v36 = vsel %vm410_vm10, 1.0, %v931_v53  ;;  %vm292_vm10 = vcmp.eq.s32.totalorder %v258_v40, %v1139_v49 }
 0x114   :  { %v458_v37 = vadd.f32 %v756_v36, %v346_v34  ;;  %v734_v13 = vsel %vm292_vm10, 1.0, %v931_v53 }
 0x115   :  { %v340_v15 = vadd.f32 %v734_v13, %v228_v11 }
 0x116   :  { %834 = vmatprep.mubr.msk.f32.mxu1 %vm470_vm4, %v458_v37  ;;  %v1274_v38 = vpop.permute.xlu1 %76 }
 0x117   :  { %vm93_vm13 = vcmp.eq.s32.totalorder %v1274_v38, %v1139_v49 }
 0x118   :  { %v711_v3 = vsel %vm93_vm13, 1.0, %v931_v53 }
 0x119   :  { %v237_v21 = vadd.f32 %v727_v19, %v711_v3 }
 0x11b   :  { %v149_v39 = vpop.permute.xlu1 %148 }
 0x11c   :  { %vm181_vm11 = vcmp.eq.s32.totalorder %v149_v39, %v1139_v49 }
 0x11d   :  { %v719_v52 = vsel %vm181_vm11, 1.0, %v931_v53 }
 0x11e   :  { %v229_v17 = vadd.f32 %v719_v52, %v703_v4 }
 0x120   :  { %v367_v45 = vpop.permute.xlu1 %366 }
 0x121   :  { %vm403_vm1 = vcmp.eq.s32.totalorder %v367_v45, %v1139_v49 }
 0x122   :  { %v749_v55 = vsel %vm403_vm1, 1.0, %v931_v53  ;;  %vm301_vm1 = vcmp.eq.s32.totalorder %v285_v51, %v1139_v49 }
 0x123   :  { %v451_v57 = vadd.f32 %v749_v55, %v339_v46  ;;  %v743_v22 = vsel %vm301_vm1, 1.0, %v931_v53 }
 0x124   :  { %v391_v50 = vpop.permute.xlu1 %390  ;;  %v349_v47 = vadd.f32 %v743_v22, %v237_v21 }
 0x125   :  { %vm411_vm5 = vcmp.eq.s32.totalorder %v391_v50, %v1139_v49  ;;  %823 = vmatmul.mubr.msk.f32.gmra.mrb[4].mxu0 %vm470_vm4, %v451_v57 }
 0x126   :  { %v757_v61 = vsel %vm411_vm5, 1.0, %v931_v53 }
 0x127   :  { %v459_v0 = vadd.f32 %v757_v61, %v347_v59 }
 0x129   :  { %835 = vmatmul.mubr.msk.f32.gmra.mrb[4].mxu1 %vm470_vm4, %v459_v0  ;;  %v282_v8 = vpop.permute.xlu1 %281 }
 0x12a   :  { %vm300_vm8 = vcmp.eq.s32.totalorder %v282_v8, %v1139_v49 }
 0x12b   :  { %v742_v48 = vsel %vm300_vm8, 1.0, %v931_v53 }
 0x12c   :  { %v348_v7 = vadd.f32 %v742_v48, %v236_v1 }
 0x12d   :  { %v261_v2 = vpop.permute.xlu1 %260 }
 0x12e   :  { %v460_v10 = vadd.f32 %v758_v5, %v348_v7  ;;  %vm293_vm14 = vcmp.eq.s32.totalorder %v261_v2, %v1139_v49 }
 0x12f   :  { %v735_v58 = vsel %vm293_vm14, 1.0, %v931_v53 }
 0x130   :  { %837 = vmatprep.mubr.msk.f32.mxu1 %vm470_vm4, %v460_v10  ;;  %v341_v12 = vadd.f32 %v735_v58, %v229_v17 }
 0x132   :  { %v370_v14 = vpop.permute.xlu1 %369 }
 0x133   :  { %vm404_vm0 = vcmp.eq.s32.totalorder %v370_v14, %v1139_v49 }
 0x134   :  { %v750_v16 = vsel %vm404_vm0, 1.0, %v931_v53 }
 0x135   :  { %v452_v18 = vadd.f32 %v750_v16, %v340_v15 }
 0x136   :  { %v373_v20 = vpop.permute.xlu1 %372 }
 0x137   :  { %vm405_vm2 = vcmp.eq.s32.totalorder %v373_v20, %v1139_v49  ;;  %825 = vmatprep.mubr.msk.f32.mxu0 %vm470_vm4, %v452_v18 }
 0x138   :  { %v751_v23 = vsel %vm405_vm2, 1.0, %v931_v53 }
 0x139   :  { %v453_v24 = vadd.f32 %v751_v23, %v341_v12 }
 0x13a   :  { %v397_v25 = vpop.permute.xlu1 %396 }
 0x13b   :  { %vm413_vm3 = vcmp.eq.s32.totalorder %v397_v25, %v1139_v49  ;;  %826 = vmatmul.mubr.msk.f32.gmra.mrb[6].mxu0 %vm470_vm4, %v453_v24 }
 0x13c   :  { %v759_v26 = vsel %vm413_vm3, 1.0, %v931_v53 }
 0x13d   :  { %v461_v27 = vadd.f32 %v759_v26, %v349_v47 }
 0x13f   :  { %838 = vmatmul.mubr.msk.f32.gmra.mrb[6].mxu1 %vm470_vm4, %v461_v27 }
 0x196   :  { %v818_v28 = vpop.f32.mrb[0].mxu0 }
 0x197   :  { %665 = vst [vmem:[#allocation2 + $0x8] sm:$0xff] %v818_v28  ;;  %v585_v29 = vpop.f32.mrb[1].mxu0 }
 0x198   :  { %664 = vst [vmem:[#allocation2] sm:$0xff] %v585_v29 }
 0x19f   :  { %v830_v30 = vpop.f32.mrb[0].mxu1 }
 0x1a0   :  { %673 = vst [vmem:[#allocation2 + $0x48] sm:$0xff] %v830_v30  ;;  %v625_v31 = vpop.f32.mrb[1].mxu1 }
 0x1a1   :  { %672 = vst [vmem:[#allocation2 + $0x40] sm:$0xff] %v625_v31 }
 0x1a5   :  { %v821_v32 = vpop.f32.mrb[2].mxu0 }
 0x1a6   :  { %667 = vst [vmem:[#allocation2 + $0x18] sm:$0xff] %v821_v32  ;;  %v595_v34 = vpop.f32.mrb[3].mxu0 }
 0x1a7   :  { %666 = vst [vmem:[#allocation2 + $0x10] sm:$0xff] %v595_v34 }
 0x1c9   :  { %v833_v49 = vpop.f32.mrb[2].mxu1 }
 0x1ca   :  { %675 = vst [vmem:[#allocation2 + $0x58] sm:$0xff] %v833_v49  ;;  %v635_v36 = vpop.f32.mrb[3].mxu1 }
 0x1cb   :  { %674 = vst [vmem:[#allocation2 + $0x50] sm:$0xff] %v635_v36 }
 0x1f8   :  { %v824_v53 = vpop.f32.mrb[4].mxu0 }
 0x1f9   :  { %669 = vst [vmem:[#allocation2 + $0x28] sm:$0xff] %v824_v53  ;;  %v605_v37 = vpop.f32.mrb[5].mxu0 }
 0x1fa   :  { %668 = vst [vmem:[#allocation2 + $0x20] sm:$0xff] %v605_v37 }
 0x1fc   :  { %v836_v38 = vpop.f32.mrb[4].mxu1 }
 0x1fd   :  { %677 = vst [vmem:[#allocation2 + $0x68] sm:$0xff] %v836_v38  ;;  %v645_v39 = vpop.f32.mrb[5].mxu1 }
 0x1fe   :  { %676 = vst [vmem:[#allocation2 + $0x60] sm:$0xff] %v645_v39 }
 0x20e   :  { %v827_v33 = vpop.f32.mrb[6].mxu0 }
 0x20f   :  { %671 = vst [vmem:[#allocation2 + $0x38] sm:$0xff] %v827_v33  ;;  %v615_v40 = vpop.f32.mrb[7].mxu0 }
 0x210   :  { %670 = vst [vmem:[#allocation2 + $0x30] sm:$0xff] %v615_v40 }
 0x212   :  { %v839_v41 = vpop.f32.mrb[6].mxu1 }
 0x213   :  { %679 = vst [vmem:[#allocation2 + $0x78] sm:$0xff] %v839_v41  ;;  %v655_v42 = vpop.f32.mrb[7].mxu1 }
 0x214   :  { %678 = vst [vmem:[#allocation2 + $0x70] sm:$0xff] %v655_v42 }
 0x215   :  { %914 = shalt.err (!%p911_p4)
}
 0x216   :  { %s915_s4 = scalar_lea.hbm %s1351_s2, 2048 }
 0x217   :  { %p916_p5 = scmp.ne.s32.totalorder %s1351_s2, %s915_s4  ;;  %p919_p6 = scmp.lt.u32.totalorder %s915_s4, %s1351_s2 }
 0x219   :  { %p921_p7 = pnand %p919_p6, %p916_p5 }
 0x21b   :  { %924 = shalt.err (!%p921_p7)
}
 0x21c   :  { %s933_s9 = smov 128   ;;  %s934_s10 = smov 8  }
 0x21d   :  { %691 = dma.vmem_to_hbm [thread:$0]  %s686_s28, 2048, %s1351_s2, [#allocation3], %s933_s9, %s933_s9, %s934_s10  }
 0x21e   :  { %925 = dma.done.wait [#allocation3], 2048  }
 0x21f   :  { %926 = vsyncadd [#allocation3], 4294965248 }
 0x220   :  { %695 = vsyncpa [#allocation3], 1 }

</bundles_post_ra>
